<compile_context>
chip_gen: v5e
topology: v5e:2x2
jax: 0.10.0
libtpu: 0.0.40
codegen_flags: <defaults>
</compile_context>

<pallas_src>
import jax
import jax.numpy as jnp
from jax.experimental import pallas as pl
from jax.experimental.pallas import tpu as pltpu


def _generator_mlp_kernel(x_ref, w1_ref, b1_ref, w2_ref, b2_ref,
                          w3_ref, b3_ref, o_ref):
    """Fused 3-layer MLP: Linear -> ReLU -> Linear -> ReLU -> Linear -> Tanh."""
    bf16 = jnp.bfloat16

    # --- Layer 1: bf16 MXU operands (inputs already bf16), f32 accumulate ---
    h1 = jnp.dot(x_ref[...], w1_ref[...], preferred_element_type=jnp.float32)
    h1 = jnp.maximum(h1 + b1_ref[...], 0.0)                   # f32 bias + ReLU

    # --- Layer 2 ---
    h2 = jnp.dot(h1.astype(bf16), w2_ref[...],
                 preferred_element_type=jnp.float32)
    h2 = jnp.maximum(h2 + b2_ref[...], 0.0)                   # f32 bias + ReLU

    # --- Layer 3 + Tanh ---
    h3 = jnp.dot(h2.astype(bf16), w3_ref[...],
                 preferred_element_type=jnp.float32)
    o_ref[...] = jnp.tanh(h3 + b3_ref[...]).astype(o_ref.dtype)


def generator_forward(z, labels, kparams, *, batch_tile=512,
                      out_dtype=jnp.float32):
    """Run the fused Pallas MLP.

    z: [B, latent] f32, labels: [B, classes] f32.
    kparams: (W1 [din,512] bf16, b1 [1,512] f32, W2 [512,256] bf16,
              b2 [1,256] f32, W3 [256,nf] bf16, b3 [1,nf] f32).
    """
    w1, b1, w2, b2, w3, b3 = kparams
    B = z.shape[0]
    din = w1.shape[0]
    nf = w3.shape[1]
    assert z.shape[1] + labels.shape[1] == din

    # Fused concat (single layer-1 dot) + bf16 inputs (half the input DMA bytes).
    x = jnp.concatenate([z, labels], axis=1).astype(jnp.bfloat16)

    # Batch tiling: multiple of 8 rows, <= batch_tile; prefer >= 2 grid steps
    # so the "parallel" axis can shard across v7x's two TensorCores.
    b8 = 8 * pl.cdiv(B, 8)
    TB = min(batch_tile, b8)
    if TB == b8 and b8 >= 16:          # would be a 1-step grid: split in half
        TB = 8 * pl.cdiv(b8 // 2, 8)
    Bp = TB * pl.cdiv(B, TB)
    if Bp != B:
        x = jnp.pad(x, ((0, Bp - B), (0, 0)))

    # Weights / biases stay VMEM-resident across batch tiles.
    resident = lambda a: pl.BlockSpec(a.shape, lambda i: (0,) * a.ndim)

    out = pl.pallas_call(
        _generator_mlp_kernel,
        out_shape=jax.ShapeDtypeStruct((Bp, nf), out_dtype),
        grid=(Bp // TB,),
        in_specs=[
            pl.BlockSpec((TB, din), lambda i: (i, 0)),        # fused [z|labels]
            resident(w1), resident(b1),
            resident(w2), resident(b2),
            resident(w3), resident(b3),
        ],
        out_specs=pl.BlockSpec((TB, nf), lambda i: (i, 0)),
        compiler_params=pltpu.CompilerParams(
            dimension_semantics=("parallel",)),
    )(x, w1, b1, w2, b2, w3, b3)

    return out[:B]


def init_params(key, latent_dim, num_classes, num_features):
    """f32 parameters matching the nn.Linear stack (pre-transposed to [in, out])."""
    din = latent_dim + num_classes
    keys = jax.random.split(key, 6)

    def lin(kw, kb, fin, fout):
        bound = 1.0 / (fin ** 0.5)
        w = jax.random.uniform(kw, (fin, fout), jnp.float32, -bound, bound)
        b = jax.random.uniform(kb, (1, fout), jnp.float32, -bound, bound)
        return w, b

    w1, b1 = lin(keys[0], keys[1], din, 512)
    w2, b2 = lin(keys[2], keys[3], 512, 256)
    w3, b3 = lin(keys[4], keys[5], 256, num_features)
    return (w1, b1, w2, b2, w3, b3)


def cast_params_for_kernel(params_f32):
    """bf16 MXU weights, f32 biases."""
    w1, b1, w2, b2, w3, b3 = params_f32
    bf16 = jnp.bfloat16
    return (w1.astype(bf16), b1, w2.astype(bf16), b2, w3.astype(bf16), b3)


def _reference_forward_bf16(z, labels, kparams):
    """Pure-JAX reference with the same bf16-operand / f32-accumulate recipe."""
    w1, b1, w2, b2, w3, b3 = kparams
    bf16 = jnp.bfloat16
    x = jnp.concatenate([z, labels], axis=1).astype(bf16)
    h1 = jnp.maximum(
        jnp.dot(x, w1, preferred_element_type=jnp.float32) + b1, 0.0)
    h2 = jnp.maximum(
        jnp.dot(h1.astype(bf16), w2, preferred_element_type=jnp.float32) + b2, 0.0)
    return jnp.tanh(
        jnp.dot(h2.astype(bf16), w3, preferred_element_type=jnp.float32) + b3)


def _reference_forward_f32(z, labels, params_f32):
    """Full-f32 reference mirroring the original PyTorch Linear stack."""
    w1, b1, w2, b2, w3, b3 = params_f32
    x = jnp.concatenate([z, labels], axis=1)
    h1 = jnp.maximum(x @ w1 + b1, 0.0)
    h2 = jnp.maximum(h1 @ w2 + b2, 0.0)
    return jnp.tanh(h2 @ w3 + b3)


if __name__ == "__main__":
    latent_dim, num_classes, num_features = 32, 10, 64
    batch = 8

    key = jax.random.PRNGKey(0)
    kz, kl, kp = jax.random.split(key, 3)

    z = jax.random.normal(kz, (batch, latent_dim), jnp.float32)
    # one-hot labels (cGAN-style conditioning)
    label_idx = jax.random.randint(kl, (batch,), 0, num_classes)
    labels = jax.nn.one_hot(label_idx, num_classes, dtype=jnp.float32)

    params_f32 = init_params(kp, latent_dim, num_classes, num_features)
    kparams = cast_params_for_kernel(params_f32)

    out = generator_forward(z, labels, kparams)
    jax.block_until_ready(out)

    ref_bf16 = _reference_forward_bf16(z, labels, kparams)
    ref_f32 = _reference_forward_f32(z, labels, params_f32)

    assert out.shape == (batch, num_features)
    assert bool(jnp.all(jnp.abs(out) <= 1.0 + 1e-6))           # tanh range
    assert bool(jnp.allclose(out, ref_bf16, atol=2e-3, rtol=0.0))  # same-recipe ref
    assert bool(jnp.allclose(out, ref_f32, atol=5e-2, rtol=0.0))   # f32 PyTorch-style ref
    print("KERNEL_OK")
</pallas_src>

<mosaic_0001>
module attributes {stable_mosaic.version = 11 : i64} {
  func.func @_generator_mlp_kernel(%arg0: i32, %arg1: memref<8x42xbf16, #tpu.memory_space<vmem>>, %arg2: memref<42x512xbf16, #tpu.memory_space<vmem>>, %arg3: memref<1x512xf32, #tpu.memory_space<vmem>>, %arg4: memref<512x256xbf16, #tpu.memory_space<vmem>>, %arg5: memref<1x256xf32, #tpu.memory_space<vmem>>, %arg6: memref<256x64xbf16, #tpu.memory_space<vmem>>, %arg7: memref<1x64xf32, #tpu.memory_space<vmem>>, %arg8: memref<8x64xf32, #tpu.memory_space<vmem>>) attributes {dimension_semantics = [#tpu.dimension_semantics<parallel>], iteration_bounds = array<i64: 1>, scalar_prefetch = 0 : i64, scratch_operands = 0 : i64, tpu.core_type = #tpu.core_type<tc>, window_params = [{transform_indices = @transform_0, window_bounds = array<i64: 8, 42>}, {pipeline_mode = #tpu.pipeline_mode<synchronous>, transform_indices = @transform_1, window_bounds = array<i64: 42, 512>}, {pipeline_mode = #tpu.pipeline_mode<synchronous>, transform_indices = @transform_2, window_bounds = array<i64: 1, 512>}, {pipeline_mode = #tpu.pipeline_mode<synchronous>, transform_indices = @transform_3, window_bounds = array<i64: 512, 256>}, {pipeline_mode = #tpu.pipeline_mode<synchronous>, transform_indices = @transform_4, window_bounds = array<i64: 1, 256>}, {pipeline_mode = #tpu.pipeline_mode<synchronous>, transform_indices = @transform_5, window_bounds = array<i64: 256, 64>}, {pipeline_mode = #tpu.pipeline_mode<synchronous>, transform_indices = @transform_6, window_bounds = array<i64: 1, 64>}, {transform_indices = @transform_7, window_bounds = array<i64: 8, 64>}]} {
    %c0 = arith.constant 0 : index
    %c0_0 = arith.constant 0 : index
    %0 = vector.load %arg1[%c0, %c0_0] : memref<8x42xbf16, #tpu.memory_space<vmem>>, vector<8x42xbf16>
    %c0_1 = arith.constant 0 : index
    %c0_2 = arith.constant 0 : index
    %1 = vector.load %arg2[%c0_1, %c0_2] : memref<42x512xbf16, #tpu.memory_space<vmem>>, vector<42x512xbf16>
    %cst = arith.constant dense<0.000000e+00> : vector<8x512xf32>
    %2 = tpu.matmul %0, %1, %cst {dimension_numbers = #tpu.dot_dimension_numbers<[1], [0], [0], [1], [0, 0, 1, 1], [], []>} : vector<8x42xbf16>, vector<42x512xbf16>, vector<8x512xf32> -> vector<8x512xf32>
    %c0_3 = arith.constant 0 : index
    %c0_4 = arith.constant 0 : index
    %3 = vector.load %arg3[%c0_3, %c0_4] : memref<1x512xf32, #tpu.memory_space<vmem>>, vector<1x512xf32>
    %4 = vector.broadcast %3 : vector<1x512xf32> to vector<8x512xf32>
    %5 = arith.addf %2, %4 : vector<8x512xf32>
    %cst_5 = arith.constant 0.000000e+00 : f32
    %6 = vector.broadcast %cst_5 : f32 to vector<8x512xf32>
    %7 = arith.maximumf %5, %6 : vector<8x512xf32>
    %8 = arith.truncf %7 : vector<8x512xf32> to vector<8x512xbf16>
    %c0_6 = arith.constant 0 : index
    %c0_7 = arith.constant 0 : index
    %9 = vector.load %arg4[%c0_6, %c0_7] : memref<512x256xbf16, #tpu.memory_space<vmem>>, vector<512x256xbf16>
    %cst_8 = arith.constant dense<0.000000e+00> : vector<8x256xf32>
    %10 = tpu.matmul %8, %9, %cst_8 {dimension_numbers = #tpu.dot_dimension_numbers<[1], [0], [0], [1], [0, 0, 1, 1], [], []>} : vector<8x512xbf16>, vector<512x256xbf16>, vector<8x256xf32> -> vector<8x256xf32>
    %c0_9 = arith.constant 0 : index
    %c0_10 = arith.constant 0 : index
    %11 = vector.load %arg5[%c0_9, %c0_10] : memref<1x256xf32, #tpu.memory_space<vmem>>, vector<1x256xf32>
    %12 = vector.broadcast %11 : vector<1x256xf32> to vector<8x256xf32>
    %13 = arith.addf %10, %12 : vector<8x256xf32>
    %cst_11 = arith.constant 0.000000e+00 : f32
    %14 = vector.broadcast %cst_11 : f32 to vector<8x256xf32>
    %15 = arith.maximumf %13, %14 : vector<8x256xf32>
    %16 = arith.truncf %15 : vector<8x256xf32> to vector<8x256xbf16>
    %c0_12 = arith.constant 0 : index
    %c0_13 = arith.constant 0 : index
    %17 = vector.load %arg6[%c0_12, %c0_13] : memref<256x64xbf16, #tpu.memory_space<vmem>>, vector<256x64xbf16>
    %cst_14 = arith.constant dense<0.000000e+00> : vector<8x64xf32>
    %18 = tpu.matmul %16, %17, %cst_14 {dimension_numbers = #tpu.dot_dimension_numbers<[1], [0], [0], [1], [0, 0, 1, 1], [], []>} : vector<8x256xbf16>, vector<256x64xbf16>, vector<8x64xf32> -> vector<8x64xf32>
    %c0_15 = arith.constant 0 : index
    %c0_16 = arith.constant 0 : index
    %19 = vector.load %arg7[%c0_15, %c0_16] : memref<1x64xf32, #tpu.memory_space<vmem>>, vector<1x64xf32>
    %20 = vector.broadcast %19 : vector<1x64xf32> to vector<8x64xf32>
    %21 = arith.addf %18, %20 : vector<8x64xf32>
    %22 = math.tanh %21 : vector<8x64xf32>
    %c0_17 = arith.constant 0 : index
    %c0_18 = arith.constant 0 : index
    %23 = vector.load %arg8[%c0_17, %c0_18] : memref<8x64xf32, #tpu.memory_space<vmem>>, vector<8x64xf32>
    tpu.vector_store %arg8[%c0_17, %c0_18], %22 {strides = array<i32>} : memref<8x64xf32, #tpu.memory_space<vmem>>, vector<8x64xf32>,
    return
  }
  func.func @transform_0(%arg0: i32) -> (i32, i32) {
    %c0_i32 = arith.constant 0 : i32
    %c0_i32_0 = arith.constant 0 : i32
    return %arg0, %c0_i32 : i32, i32
  }
  func.func @transform_1(%arg0: i32) -> (i32, i32) {
    %c0_i32 = arith.constant 0 : i32
    %c0_i32_0 = arith.constant 0 : i32
    %c0_i32_1 = arith.constant 0 : i32
    return %c0_i32, %c0_i32_0 : i32, i32
  }
  func.func @transform_2(%arg0: i32) -> (i32, i32) {
    %c0_i32 = arith.constant 0 : i32
    %c0_i32_0 = arith.constant 0 : i32
    %c0_i32_1 = arith.constant 0 : i32
    return %c0_i32, %c0_i32_0 : i32, i32
  }
  func.func @transform_3(%arg0: i32) -> (i32, i32) {
    %c0_i32 = arith.constant 0 : i32
    %c0_i32_0 = arith.constant 0 : i32
    %c0_i32_1 = arith.constant 0 : i32
    return %c0_i32, %c0_i32_0 : i32, i32
  }
  func.func @transform_4(%arg0: i32) -> (i32, i32) {
    %c0_i32 = arith.constant 0 : i32
    %c0_i32_0 = arith.constant 0 : i32
    %c0_i32_1 = arith.constant 0 : i32
    return %c0_i32, %c0_i32_0 : i32, i32
  }
  func.func @transform_5(%arg0: i32) -> (i32, i32) {
    %c0_i32 = arith.constant 0 : i32
    %c0_i32_0 = arith.constant 0 : i32
    %c0_i32_1 = arith.constant 0 : i32
    return %c0_i32, %c0_i32_0 : i32, i32
  }
  func.func @transform_6(%arg0: i32) -> (i32, i32) {
    %c0_i32 = arith.constant 0 : i32
    %c0_i32_0 = arith.constant 0 : i32
    %c0_i32_1 = arith.constant 0 : i32
    return %c0_i32, %c0_i32_0 : i32, i32
  }
  func.func @transform_7(%arg0: i32) -> (i32, i32) {
    %c0_i32 = arith.constant 0 : i32
    %c0_i32_0 = arith.constant 0 : i32
    return %arg0, %c0_i32 : i32, i32
  }
}

</mosaic_0001>

<bundles_post_ra>
// kernel: tpu_custom_call.1
= control target key start
LH: loop header
LB: loop body
LE: loop exit
PB: predicated region body
PF: predicated region fallthrough
CT: control target
= control target key end

     0   :  { %12 = vsyncpa [#allocation3], 0  ;;  %s1595_s0 = inlined_call_operand.vmem [shape: bf16[8,42], index: 0, kind: input, shape index: {}]   ;;  %s1596_s1 = inlined_call_operand.vmem [shape: bf16[42,512], index: 1, kind: input, shape index: {}]   ;;  %s1597_s2 = inlined_call_operand.vmem [shape: f32[1,512], index: 2, kind: input, shape index: {}]   ;;  %s1598_s3 = inlined_call_operand.hbm [shape: bf16[512,256], index: 3, kind: input, shape index: {}]   ;;  %s1599_s4 = inlined_call_operand.vmem [shape: f32[1,256], index: 4, kind: input, shape index: {}]   ;;  %s1600_s5 = inlined_call_operand.vmem [shape: bf16[256,64], index: 5, kind: input, shape index: {}]   ;;  %s1601_s6 = inlined_call_operand.vmem [shape: f32[1,64], index: 6, kind: input, shape index: {}]   ;;  %s1602_s7 = inlined_call_operand.hbm [shape: f32[8,64], index: 7, kind: output, shape index: {}]  }
   0x1   :  { %13 = vsyncpa [#allocation4], 0  ;;  %s24_s26 = sshll.u32 %s1598_s3, 4  ;;  %s1399_s27 = smov [#allocation2]   ;;  %s25_s26 = int_to_ptr.hbm [resolvable:$true] %s24_s26 }
   0x2   :  { %s26_s28 = sshll.u32 %s1399_s27, 4  ;;  %s1400_s29 = smov 128   ;;  %s27_s28 = int_to_ptr.vmem [resolvable:$true] %s26_s28 }
   0x3   :  { %s1401_s30 = smov 8  }
   0x4   :  { %32 = dma.hbm_to_vmem [thread:$0]  %s25_s26, 8192, %s27_s28, [#allocation3], %s1400_s29, %s1400_s29, %s1401_s30  }
   0x5   :  { %1395 = dma.done.wait [#allocation3], 8192  }
   0x6   :  { %1396 = vsyncadd [#allocation3], 4294959104  ;;  %vm127_vm0 = vcmask 1044480   ;;  %v910_v0 = vld [vmem:[%s1596_s1 + $0x40] sm:$0xf]  ;;  %vm123_vm1 = vcmask 343040  }
   0x7   :  { %v1258_v1 = vld [vmem:[%s1596_s1 + $0x4c] sm:$0x10]  ;;  %v1256_v2 = vld [vmem:[%s1596_s1 + $0x44] sm:$0xf]  ;;  %v912_v4 = vld [vmem:[%s1596_s1 + $0x50] sm:$0x10] }
   0x8   :  { %v911_v3 = vor.u32 %v1258_v1, %v910_v0  ;;  %v894_v5 = vld [vmem:[%s1596_s1 + $0x20] sm:$0xf]  ;;  %v1254_v6 = vld [vmem:[%s1596_s1 + $0x2c] sm:$0xf0]  ;;  %v915_v7 = vor.u32 %v1256_v2, %v912_v4  ;;  %v1252_v8 = vld [vmem:[%s1596_s1 + $0x24] sm:$0xf] }
   0x9   :  { %v896_v9 = vld [vmem:[%s1596_s1 + $0x30] sm:$0xf0]  ;;  %v895_v12 = vor.u32 %v1254_v6, %v894_v5  ;;  %v878_v13 = vld [vmem:[%s1596_s1] sm:$0xf]  ;;  %v1250_v14 = vld [vmem:[%s1596_s1 + $0xc] sm:$0xf0] }
   0xa   :  { %v129_v10 = vsel %vm127_vm0, %v911_v3, 0  ;;  %v132_v11 = vsel %vm127_vm0, %v915_v7, 0  ;;  %v899_v15 = vor.u32 %v1252_v8, %v896_v9  ;;  %v918_v16 = vld [vmem:[%s1596_s1 + $0x48] sm:$0xf]  ;;  %v1259_v17 = vld [vmem:[%s1596_s1 + $0x54] sm:$0x10]  ;;  %v879_v24 = vor.u32 %v1250_v14, %v878_v13 }
   0xb   :  { %145 = vmatpush.bf16.msra.mxu2 %v129_v10  ;;  %158 = vmatpush.bf16.msra.mxu3 %v132_v11  ;;  %v1257_v18 = vld [vmem:[%s1596_s1 + $0x4c] sm:$0xf]  ;;  %v1248_v19 = vld [vmem:[%s1596_s1 + $0x4] sm:$0xf]  ;;  %v880_v20 = vld [vmem:[%s1596_s1 + $0x10] sm:$0xf0]  ;;  %v919_v21 = vor.u32 %v1259_v17, %v918_v16 }
   0xc   :  { %v920_v22 = vld [vmem:[%s1596_s1 + $0x58] sm:$0x10]  ;;  %v902_v25 = vld [vmem:[%s1596_s1 + $0x28] sm:$0xf]  ;;  %v1255_v26 = vld [vmem:[%s1596_s1 + $0x34] sm:$0xf0]  ;;  %v883_v27 = vor.u32 %v1248_v19, %v880_v20 }
   0xd   :  { %v923_v23 = vor.u32 %v1257_v18, %v920_v22  ;;  %v135_v28 = vsel %vm127_vm0, %v919_v21, 0  ;;  %v1253_v29 = vld [vmem:[%s1596_s1 + $0x2c] sm:$0xf]  ;;  %v904_v30 = vld [vmem:[%s1596_s1 + $0x38] sm:$0xf0]  ;;  %v903_v43 = vor.u32 %v1255_v26, %v902_v25  ;;  %s1402_s15 = smov [#allocation5]  }
   0xe   :  { %v986_v31 = vld [vmem:[#allocation2 + $0x70] sm:$0xf]  ;;  %v1275_v32 = vld [vmem:[#allocation2 + $0x74] sm:$0xf0]  ;;  %v978_v38 = vld [vmem:[#allocation2 + $0x60] sm:$0xf]  ;;  %v907_v45 = vor.u32 %v1253_v29, %v904_v30 }
   0xf   :  { %146 = vmatpush.bf16.msra.mxu2 %v895_v12  ;;  %159 = vmatpush.bf16.msra.mxu3 %v899_v15  ;;  %v1050_v33 = vld [vmem:[#allocation2 + $0xf0] sm:$0xf]  ;;  %v1291_v34 = vld [vmem:[#allocation2 + $0xf4] sm:$0xf0]  ;;  %v138_v35 = vsel %vm127_vm0, %v923_v23, 0  ;;  %v987_v36 = vor.u32 %v1275_v32, %v986_v31  ;;  %s864_s16 = sshll.u32 %s1402_s15, 4  ;;  %s865_s16 = int_to_ptr.vmem [resolvable:$true] %s864_s16 }
  0x10   :  { %v1051_v37 = vor.u32 %v1291_v34, %v1050_v33  ;;  %v1273_v39 = vld [vmem:[#allocation2 + $0x64] sm:$0xf0]  ;;  %v1513_v40 = vld [vmem:[%s1595_s0] sm:$0xf]  ;;  %v1251_v46 = vld [vmem:[%s1596_s1 + $0x14] sm:$0xf0] }
  0x11   :  { %v1042_v41 = vld [vmem:[#allocation2 + $0xe0] sm:$0xf]  ;;  %v1289_v42 = vld [vmem:[#allocation2 + $0xe4] sm:$0xf0]  ;;  %v1249_v47 = vld [vmem:[%s1596_s1 + $0xc] sm:$0xf]  ;;  %590 = vmatpush.bf16.msra.mxu0 %v987_v36  ;;  %v979_v49 = vor.u32 %v1273_v39, %v978_v38 }
  0x12   :  { %v886_v44 = vld [vmem:[%s1596_s1 + $0x8] sm:$0xf]  ;;  %v888_v48 = vld [vmem:[%s1596_s1 + $0x18] sm:$0xf0]  ;;  %603 = vmatpush.bf16.msra.mxu1 %v1051_v37  ;;  %v1043_v50 = vor.u32 %v1289_v42, %v1042_v41  ;;  %v970_v51 = vld [vmem:[#allocation2 + $0x50] sm:$0xf] }
  0x13   :  { %147 = vmatpush.bf16.msra.mxu2 %v879_v24  ;;  %160 = vmatpush.bf16.msra.mxu3 %v883_v27  ;;  %v1271_v52 = vld [vmem:[#allocation2 + $0x54] sm:$0xf0]  ;;  %v1034_v53 = vld [vmem:[#allocation2 + $0xd0] sm:$0xf]  ;;  %v887_v57 = vor.u32 %v1251_v46, %v886_v44  ;;  %v891_v60 = vor.u32 %v1249_v47, %v888_v48  ;;  %v962_v63 = vld [vmem:[#allocation2 + $0x40] sm:$0xf] }
  0x14   :  { %v1287_v54 = vld [vmem:[#allocation2 + $0xd4] sm:$0xf0]  ;;  %v1114_v55 = vld [vmem:[#allocation2 + $0x170] sm:$0xf]  ;;  %v971_v61 = vor.u32 %v1271_v52, %v970_v51  ;;  %v1269_v0 = vld [vmem:[#allocation2 + $0x44] sm:$0xf0] }
  0x15   :  { %v1307_v56 = vld [vmem:[#allocation2 + $0x174] sm:$0xf0]  ;;  %v1178_v58 = vld [vmem:[#allocation2 + $0x1f0] sm:$0xf]  ;;  %591 = vmatpush.bf16.msra.mxu0 %v979_v49  ;;  %v1035_v62 = vor.u32 %v1287_v54, %v1034_v53  ;;  %v1026_v1 = vld [vmem:[#allocation2 + $0xc0] sm:$0xf]  ;;  %v963_v9 = vor.u32 %v1269_v0, %v962_v63 }
  0x16   :  { %924 = vmatmul.msk.bf16.vlgmr.msra.gmra.mxu2 %vm123_vm1, %v1513_v40  ;;  %925 = vmatmul.msk.bf16.vlgmr.msra.gmra.mxu3 %vm123_vm1, %v1513_v40  ;;  %v1323_v59 = vld [vmem:[#allocation2 + $0x1f4] sm:$0xf0]  ;;  %v1115_v2 = vor.u32 %v1307_v56, %v1114_v55  ;;  %v1285_v3 = vld [vmem:[#allocation2 + $0xc4] sm:$0xf0]  ;;  %v1106_v5 = vld [vmem:[#allocation2 + $0x160] sm:$0xf] }
  0x17   :  { %171 = vmatpush.bf16.msrb.mxu2 %v135_v28  ;;  %184 = vmatpush.bf16.msrb.mxu3 %v138_v35  ;;  %v1179_v4 = vor.u32 %v1323_v59, %v1178_v58  ;;  %v1305_v6 = vld [vmem:[#allocation2 + $0x164] sm:$0xf0]  ;;  %v1170_v7 = vld [vmem:[#allocation2 + $0x1e0] sm:$0xf]  ;;  %v1027_v10 = vor.u32 %v1285_v3, %v1026_v1  ;;  %v954_v11 = vld [vmem:[#allocation2 + $0x30] sm:$0xf] }
  0x18   :  { %604 = vmatpush.bf16.msra.mxu1 %v1043_v50  ;;  %v1321_v8 = vld [vmem:[#allocation2 + $0x1e4] sm:$0xf0]  ;;  %v1267_v12 = vld [vmem:[#allocation2 + $0x34] sm:$0xf0]  ;;  %v1107_v13 = vor.u32 %v1305_v6, %v1106_v5  ;;  %v1018_v14 = vld [vmem:[#allocation2 + $0xb0] sm:$0xf] }
  0x19   :  { %592 = vmatpush.bf16.msra.mxu0 %v971_v61  ;;  %v1283_v15 = vld [vmem:[#allocation2 + $0xb4] sm:$0xf0]  ;;  %v1171_v16 = vor.u32 %v1321_v8, %v1170_v7  ;;  %v1098_v17 = vld [vmem:[#allocation2 + $0x150] sm:$0xf]  ;;  %v955_v19 = vor.u32 %v1267_v12, %v954_v11  ;;  %v946_v23 = vld [vmem:[#allocation2 + $0x20] sm:$0xf] }
  0x1a   :  { %v1303_v18 = vld [vmem:[#allocation2 + $0x154] sm:$0xf0]  ;;  %v1162_v20 = vld [vmem:[#allocation2 + $0x1d0] sm:$0xf]  ;;  %v1019_v22 = vor.u32 %v1283_v15, %v1018_v14  ;;  %v1265_v24 = vld [vmem:[#allocation2 + $0x24] sm:$0xf0] }
  0x1b   :  { %172 = vmatpush.bf16.msrb.mxu2 %v903_v43  ;;  %185 = vmatpush.bf16.msrb.mxu3 %v907_v45  ;;  %v1319_v21 = vld [vmem:[#allocation2 + $0x1d4] sm:$0xf0]  ;;  %v1010_v25 = vld [vmem:[#allocation2 + $0xa0] sm:$0xf]  ;;  %v1281_v26 = vld [vmem:[#allocation2 + $0xa4] sm:$0xf0]  ;;  %v1099_v27 = vor.u32 %v1303_v18, %v1098_v17  ;;  %v947_v31 = vor.u32 %v1265_v24, %v946_v23 }
  0x1c   :  { %605 = vmatpush.bf16.msra.mxu1 %v1035_v62  ;;  %v1163_v28 = vor.u32 %v1319_v21, %v1162_v20  ;;  %v1090_v29 = vld [vmem:[#allocation2 + $0x140] sm:$0xf]  ;;  %v1301_v30 = vld [vmem:[#allocation2 + $0x144] sm:$0xf0]  ;;  %v1011_v34 = vor.u32 %v1281_v26, %v1010_v25  ;;  %v938_v35 = vld [vmem:[#allocation2 + $0x10] sm:$0xf] }
  0x1d   :  { %593 = vmatpush.bf16.msra.mxu0 %v963_v9  ;;  %v1154_v32 = vld [vmem:[#allocation2 + $0x1c0] sm:$0xf]  ;;  %v1317_v33 = vld [vmem:[#allocation2 + $0x1c4] sm:$0xf0]  ;;  %v1263_v36 = vld [vmem:[#allocation2 + $0x14] sm:$0xf0]  ;;  %v1091_v39 = vor.u32 %v1301_v30, %v1090_v29 }
  0x1e   :  { %v1002_v37 = vld [vmem:[#allocation2 + $0x90] sm:$0xf]  ;;  %v1279_v38 = vld [vmem:[#allocation2 + $0x94] sm:$0xf0]  ;;  %v1155_v41 = vor.u32 %v1317_v33, %v1154_v32  ;;  %v939_v44 = vor.u32 %v1263_v36, %v938_v35  ;;  %v930_v45 = vld [vmem:[#allocation2] sm:$0xf] }
  0x1f   :  { %173 = vmatpush.bf16.msrb.mxu2 %v887_v57  ;;  %186 = vmatpush.bf16.msrb.mxu3 %v891_v60  ;;  %v1082_v42 = vld [vmem:[#allocation2 + $0x130] sm:$0xf]  ;;  %v1299_v43 = vld [vmem:[#allocation2 + $0x134] sm:$0xf0]  ;;  %v1003_v48 = vor.u32 %v1279_v38, %v1002_v37  ;;  %v1261_v49 = vld [vmem:[#allocation2 + $0x4] sm:$0xf0] }
  0x20   :  { %606 = vmatpush.bf16.msra.mxu1 %v1027_v10  ;;  %v1146_v46 = vld [vmem:[#allocation2 + $0x1b0] sm:$0xf]  ;;  %v1315_v47 = vld [vmem:[#allocation2 + $0x1b4] sm:$0xf0]  ;;  %v994_v50 = vld [vmem:[#allocation2 + $0x80] sm:$0xf]  ;;  %v1083_v54 = vor.u32 %v1299_v43, %v1082_v42  ;;  %v931_v59 = vor.u32 %v1261_v49, %v930_v45 }
  0x21   :  { %594 = vmatpush.bf16.msra.mxu0 %v955_v19  ;;  %v1277_v51 = vld [vmem:[#allocation2 + $0x84] sm:$0xf0]  ;;  %v988_v52 = vld [vmem:[#allocation2 + $0x78] sm:$0xf0]  ;;  %v1290_v53 = vld [vmem:[#allocation2 + $0xf4] sm:$0xf]  ;;  %v1147_v56 = vor.u32 %v1315_v47, %v1146_v46 }
  0x22   :  { %v1052_v55 = vld [vmem:[#allocation2 + $0xf8] sm:$0xf0]  ;;  %v1074_v57 = vld [vmem:[#allocation2 + $0x120] sm:$0xf]  ;;  %v1297_v58 = vld [vmem:[#allocation2 + $0x124] sm:$0xf0]  ;;  %v995_v62 = vor.u32 %v1277_v51, %v994_v50 }
  0x23   :  { %616 = vmatpush.bf16.msra.mxu2 %v1115_v2  ;;  %629 = vmatpush.bf16.msra.mxu3 %v1179_v4  ;;  %v1138_v60 = vld [vmem:[#allocation2 + $0x1a0] sm:$0xf]  ;;  %v1313_v61 = vld [vmem:[#allocation2 + $0x1a4] sm:$0xf0]  ;;  %v1055_v0 = vor.u32 %v1290_v53, %v1052_v55  ;;  %v1272_v1 = vld [vmem:[#allocation2 + $0x64] sm:$0xf]  ;;  %v1075_v3 = vor.u32 %v1297_v58, %v1074_v57 }
  0x24   :  { %607 = vmatpush.bf16.msra.mxu1 %v1019_v22  ;;  %v980_v2 = vld [vmem:[#allocation2 + $0x68] sm:$0xf0]  ;;  %v1288_v4 = vld [vmem:[#allocation2 + $0xe4] sm:$0xf]  ;;  %v1139_v6 = vor.u32 %v1313_v61, %v1138_v60  ;;  %v1270_v9 = vld [vmem:[#allocation2 + $0x54] sm:$0xf] }
  0x25   :  { %595 = vmatpush.bf16.msra.mxu0 %v947_v31  ;;  %v1044_v5 = vld [vmem:[#allocation2 + $0xe8] sm:$0xf0]  ;;  %v983_v7 = vor.u32 %v1272_v1, %v980_v2  ;;  %v972_v10 = vld [vmem:[#allocation2 + $0x58] sm:$0xf0]  ;;  %v1286_v11 = vld [vmem:[#allocation2 + $0xd4] sm:$0xf] }
  0x26   :  { %926 = vmatmul.msk.bf16.vlgmr.msrb.gmra.mxu2 %vm123_vm1, %v1513_v40  ;;  %927 = vmatmul.msk.bf16.vlgmr.msrb.gmra.mxu3 %vm123_vm1, %v1513_v40  ;;  %v1274_v40 = vld [vmem:[#allocation2 + $0x74] sm:$0xf]  ;;  %v1047_v8 = vor.u32 %v1288_v4, %v1044_v5  ;;  %v975_v12 = vor.u32 %v1270_v9, %v972_v10  ;;  %v1066_v15 = vld [vmem:[#allocation2 + $0x110] sm:$0xf]  ;;  %v1311_v19 = vld [vmem:[#allocation2 + $0x194] sm:$0xf0] }
  0x27   :  { %617 = vmatpush.bf16.msra.mxu2 %v1107_v13  ;;  %630 = vmatpush.bf16.msra.mxu3 %v1171_v16  ;;  %v991_v63 = vor.u32 %v1274_v40, %v988_v52  ;;  %v1036_v13 = vld [vmem:[#allocation2 + $0xd8] sm:$0xf0]  ;;  %v1295_v16 = vld [vmem:[#allocation2 + $0x114] sm:$0xf0]  ;;  %v1130_v17 = vld [vmem:[#allocation2 + $0x190] sm:$0xf] }
  0x28   :  { %608 = vmatpush.bf16.msra.mxu1 %v1011_v34  ;;  %v1039_v14 = vor.u32 %v1286_v11, %v1036_v13  ;;  %v1067_v18 = vor.u32 %v1295_v16, %v1066_v15  ;;  %v1268_v20 = vld [vmem:[#allocation2 + $0x44] sm:$0xf]  ;;  %v964_v21 = vld [vmem:[#allocation2 + $0x48] sm:$0xf0]  ;;  %v1131_v22 = vor.u32 %v1311_v19, %v1130_v17  ;;  %v1122_v29 = vld [vmem:[#allocation2 + $0x180] sm:$0xf] }
  0x29   :  { %596 = vmatpush.bf16.msra.mxu0 %v939_v44  ;;  %v967_v23 = vor.u32 %v1268_v20, %v964_v21  ;;  %v1284_v24 = vld [vmem:[#allocation2 + $0xc4] sm:$0xf]  ;;  %v1028_v25 = vld [vmem:[#allocation2 + $0xc8] sm:$0xf0]  ;;  %v1309_v31 = vld [vmem:[#allocation2 + $0x184] sm:$0xf0] }
  0x2a   :  { %v1031_v26 = vor.u32 %v1284_v24, %v1028_v25  ;;  %v1266_v32 = vld [vmem:[#allocation2 + $0x34] sm:$0xf]  ;;  %v956_v33 = vld [vmem:[#allocation2 + $0x38] sm:$0xf0]  ;;  %v1123_v34 = vor.u32 %v1309_v31, %v1122_v29  ;;  %v1264_v46 = vld [vmem:[#allocation2 + $0x24] sm:$0xf] }
  0x2b   :  { %618 = vmatpush.bf16.msra.mxu2 %v1099_v27  ;;  %631 = vmatpush.bf16.msra.mxu3 %v1163_v28  ;;  %v1058_v27 = vld [vmem:[#allocation2 + $0x100] sm:$0xf]  ;;  %v1293_v28 = vld [vmem:[#allocation2 + $0x104] sm:$0xf0]  ;;  %v959_v35 = vor.u32 %v1266_v32, %v956_v33  ;;  %v1282_v36 = vld [vmem:[#allocation2 + $0xb4] sm:$0xf] }
  0x2c   :  { %609 = vmatpush.bf16.msra.mxu1 %v1003_v48  ;;  %v1059_v30 = vor.u32 %v1293_v28, %v1058_v27  ;;  %v1020_v37 = vld [vmem:[#allocation2 + $0xb8] sm:$0xf0]  ;;  %v1306_v38 = vld [vmem:[#allocation2 + $0x174] sm:$0xf]  ;;  %v948_v47 = vld [vmem:[#allocation2 + $0x28] sm:$0xf0] }
  0x2d   :  { %597 = vmatpush.bf16.msra.mxu0 %v931_v59  ;;  %v1322_v42 = vld [vmem:[#allocation2 + $0x1f4] sm:$0xf]  ;;  %v1180_v43 = vld [vmem:[#allocation2 + $0x1f8] sm:$0xf0]  ;;  %v1280_v48 = vld [vmem:[#allocation2 + $0xa4] sm:$0xf]  ;;  %v951_v49 = vor.u32 %v1264_v46, %v948_v47 }
  0x2e   :  { %v1183_v45 = vor.u32 %v1322_v42, %v1180_v43  ;;  %v1012_v50 = vld [vmem:[#allocation2 + $0xa8] sm:$0xf0]  ;;  %v1304_v51 = vld [vmem:[#allocation2 + $0x164] sm:$0xf]  ;;  %v1262_v57 = vld [vmem:[#allocation2 + $0x14] sm:$0xf] }
  0x2f   :  { %619 = vmatpush.bf16.msra.mxu2 %v1091_v39  ;;  %632 = vmatpush.bf16.msra.mxu3 %v1155_v41  ;;  %v1023_v39 = vor.u32 %v1282_v36, %v1020_v37  ;;  %v1116_v41 = vld [vmem:[#allocation2 + $0x178] sm:$0xf0]  ;;  %v1108_v40 = vld [vmem:[#allocation2 + $0x168] sm:$0xf0]  ;;  %v1015_v52 = vor.u32 %v1280_v48, %v1012_v50  ;;  %v1278_v59 = vld [vmem:[#allocation2 + $0x94] sm:$0xf] }
  0x30   :  { %610 = vmatpush.bf16.msra.mxu1 %v995_v62  ;;  %v1119_v44 = vor.u32 %v1306_v38, %v1116_v41  ;;  %v1111_v53 = vor.u32 %v1304_v51, %v1108_v40  ;;  %v1172_v55 = vld [vmem:[#allocation2 + $0x1e8] sm:$0xf0]  ;;  %v940_v58 = vld [vmem:[#allocation2 + $0x18] sm:$0xf0]  ;;  %v1302_v62 = vld [vmem:[#allocation2 + $0x154] sm:$0xf] }
  0x31   :  { %642 = vmatpush.bf16.msrb.mxu0 %v991_v63  ;;  %v943_v60 = vor.u32 %v1262_v57, %v940_v58  ;;  %v1004_v61 = vld [vmem:[#allocation2 + $0x98] sm:$0xf0]  ;;  %v1318_v2 = vld [vmem:[#allocation2 + $0x1d4] sm:$0xf]  ;;  %v1260_v5 = vld [vmem:[#allocation2 + $0x4] sm:$0xf] }
  0x32   :  { %v1100_v63 = vld [vmem:[#allocation2 + $0x158] sm:$0xf0]  ;;  %v996_v9 = vld [vmem:[#allocation2 + $0x88] sm:$0xf0]  ;;  %v1300_v10 = vld [vmem:[#allocation2 + $0x144] sm:$0xf] }
  0x33   :  { %620 = vmatpush.bf16.msra.mxu2 %v1083_v54  ;;  %633 = vmatpush.bf16.msra.mxu3 %v1147_v56  ;;  %v1320_v54 = vld [vmem:[#allocation2 + $0x1e4] sm:$0xf]  ;;  %v1103_v1 = vor.u32 %v1302_v62, %v1100_v63  ;;  %v1092_v11 = vld [vmem:[#allocation2 + $0x148] sm:$0xf0]  ;;  %v1298_v17 = vld [vmem:[#allocation2 + $0x134] sm:$0xf] }
  0x34   :  { %655 = vmatpush.bf16.msrb.mxu1 %v1055_v0  ;;  %v1175_v56 = vor.u32 %v1320_v54, %v1172_v55  ;;  %v1007_v0 = vor.u32 %v1278_v59, %v1004_v61  ;;  %v1095_v13 = vor.u32 %v1300_v10, %v1092_v11  ;;  %v1156_v15 = vld [vmem:[#allocation2 + $0x1c8] sm:$0xf0]  ;;  %v1314_v19 = vld [vmem:[#allocation2 + $0x1b4] sm:$0xf]  ;;  %v1148_v21 = vld [vmem:[#allocation2 + $0x1b8] sm:$0xf0] }
  0x35   :  { %643 = vmatpush.bf16.msrb.mxu0 %v983_v7  ;;  %v1276_v7 = vld [vmem:[#allocation2 + $0x84] sm:$0xf]  ;;  %v1076_v24 = vld [vmem:[#allocation2 + $0x128] sm:$0xf0]  ;;  %v1068_v31 = vld [vmem:[#allocation2 + $0x118] sm:$0xf0] }
  0x36   :  { %v1312_v25 = vld [vmem:[#allocation2 + $0x1a4] sm:$0xf]  ;;  %v1140_v27 = vld [vmem:[#allocation2 + $0x1a8] sm:$0xf0]  ;;  %v1310_v32 = vld [vmem:[#allocation2 + $0x194] sm:$0xf] }
  0x37   :  { %621 = vmatpush.bf16.msra.mxu2 %v1075_v3  ;;  %634 = vmatpush.bf16.msra.mxu3 %v1139_v6  ;;  %v1164_v3 = vld [vmem:[#allocation2 + $0x1d8] sm:$0xf0]  ;;  %v932_v6 = vld [vmem:[#allocation2 + $0x8] sm:$0xf0]  ;;  %v1143_v29 = vor.u32 %v1312_v25, %v1140_v27  ;;  %s866_s19 = sshll.u32 %s1602_s7, 4  ;;  %vm857_vm2 = vcmask 523264   ;;  %s867_s19 = int_to_ptr.hbm [resolvable:$true] %s866_s19 }
  0x38   :  { %656 = vmatpush.bf16.msrb.mxu1 %v1047_v8  ;;  %v1167_v4 = vor.u32 %v1318_v2, %v1164_v3  ;;  %v935_v8 = vor.u32 %v1260_v5, %v932_v6  ;;  %v1132_v33 = vld [vmem:[#allocation2 + $0x198] sm:$0xf0]  ;;  %v1060_v41 = vld [vmem:[#allocation2 + $0x108] sm:$0xf0]  ;;  %v1330_v3 = vld [vmem:[%s1600_s5 + $0x30] sm:$0xff] }
  0x39   :  { %644 = vmatpush.bf16.msrb.mxu0 %v975_v12  ;;  %v999_v12 = vor.u32 %v1276_v7, %v996_v9  ;;  %v1135_v37 = vor.u32 %v1310_v32, %v1132_v33  ;;  %v1331_v2 = vld [vmem:[%s1600_s5 + $0x38] sm:$0xff]  ;;  %v1328_v5 = vld [vmem:[%s1600_s5 + $0x20] sm:$0xff]  ;;  %v1338_v9 = vld [vmem:[%s1600_s5 + $0x70] sm:$0xff] }
  0x3a   :  { %v1327_v6 = vld [vmem:[%s1600_s5 + $0x18] sm:$0xff]  ;;  %v1325_v10 = vld [vmem:[%s1600_s5 + $0x8] sm:$0xff] }
  0x3b   :  { %622 = vmatpush.bf16.msra.mxu2 %v1067_v18  ;;  %635 = vmatpush.bf16.msra.mxu3 %v1131_v22  ;;  %v1084_v18 = vld [vmem:[#allocation2 + $0x138] sm:$0xf0]  ;;  %v1151_v22 = vor.u32 %v1314_v19, %v1148_v21  ;;  %v1337_v11 = vld [vmem:[%s1600_s5 + $0x68] sm:$0xff]  ;;  %v264_v21 = vld [vmem:[%s1599_s4] sm:$0x3] }
  0x3c   :  { %657 = vmatpush.bf16.msrb.mxu1 %v1039_v14  ;;  %v1316_v14 = vld [vmem:[#allocation2 + $0x1c4] sm:$0xf]  ;;  %v1087_v20 = vor.u32 %v1298_v17, %v1084_v18  ;;  %v1339_v7 = vld [vmem:[%s1600_s5 + $0x78] sm:$0xff]  ;;  %v1334_v17 = vld [vmem:[%s1600_s5 + $0x50] sm:$0xff] }
  0x3d   :  { %645 = vmatpush.bf16.msrb.mxu0 %v967_v23  ;;  %v1159_v16 = vor.u32 %v1316_v14, %v1156_v15  ;;  %v1296_v23 = vld [vmem:[#allocation2 + $0x124] sm:$0xf]  ;;  %v1335_v14 = vld [vmem:[%s1600_s5 + $0x58] sm:$0xff]  ;;  %v1333_v18 = vld [vmem:[%s1600_s5 + $0x48] sm:$0xff] }
  0x3e   :  { %v1079_v28 = vor.u32 %v1296_v23, %v1076_v24  ;;  %v266_v23 = vperm.slane %v264_v21, 0 }
  0x3f   :  { %623 = vmatpush.bf16.msra.mxu2 %v1059_v30  ;;  %636 = vmatpush.bf16.msra.mxu3 %v1123_v34  ;;  %v1294_v30 = vld [vmem:[#allocation2 + $0x114] sm:$0xf] }
  0x40   :  { %658 = vmatpush.bf16.msrb.mxu1 %v1031_v26  ;;  %v57_v26 = vld [vmem:[%s1597_s2] sm:$0xf]  ;;  %v1071_v36 = vor.u32 %v1294_v30, %v1068_v31 }
  0x41   :  { %646 = vmatpush.bf16.msrb.mxu0 %v959_v35  ;;  %v59_v34 = vperm.slane %v57_v26, 0  ;;  %v60_v35 = vperm.slane %v57_v26, 1  ;;  %v61_v54 = vperm.slane %v57_v26, 2  ;;  %v62_v55 = vperm.slane %v57_v26, 3 }
  0x43   :  { %668 = vmatpush.bf16.msrb.mxu2 %v1119_v44  ;;  %681 = vmatpush.bf16.msrb.mxu3 %v1183_v45  ;;  %v1308_v44 = vld [vmem:[#allocation2 + $0x184] sm:$0xf]  ;;  %v1124_v45 = vld [vmem:[#allocation2 + $0x188] sm:$0xf0] }
  0x44   :  { %659 = vmatpush.bf16.msrb.mxu1 %v1023_v39  ;;  %v1292_v39 = vld [vmem:[#allocation2 + $0x104] sm:$0xf]  ;;  %v1127_v50 = vor.u32 %v1308_v44, %v1124_v45 }
  0x45   :  { %647 = vmatpush.bf16.msrb.mxu0 %v951_v49  ;;  %v1063_v48 = vor.u32 %v1292_v39, %v1060_v41 }
  0x47   :  { %669 = vmatpush.bf16.msrb.mxu2 %v1111_v53  ;;  %682 = vmatpush.bf16.msrb.mxu3 %v1175_v56 }
  0x48   :  { %660 = vmatpush.bf16.msrb.mxu1 %v1015_v52 }
  0x49   :  { %648 = vmatpush.bf16.msrb.mxu0 %v943_v60 }
  0x4b   :  { %670 = vmatpush.bf16.msrb.mxu2 %v1103_v1  ;;  %683 = vmatpush.bf16.msrb.mxu3 %v1167_v4  ;;  %v1329_v4 = vld [vmem:[%s1600_s5 + $0x28] sm:$0xff] }
  0x4c   :  { %661 = vmatpush.bf16.msrb.mxu1 %v1007_v0 }
  0x4d   :  { %649 = vmatpush.bf16.msrb.mxu0 %v935_v8  ;;  %v1326_v8 = vld [vmem:[%s1600_s5 + $0x10] sm:$0xff] }
  0x4f   :  { %671 = vmatpush.bf16.msrb.mxu2 %v1095_v13  ;;  %684 = vmatpush.bf16.msrb.mxu3 %v1159_v16  ;;  %v1336_v13 = vld [vmem:[%s1600_s5 + $0x60] sm:$0xff] }
  0x50   :  { %662 = vmatpush.bf16.msrb.mxu1 %v999_v12  ;;  %v1324_v12 = vld [vmem:[%s1600_s5] sm:$0xff] }
  0x53   :  { %672 = vmatpush.bf16.msrb.mxu2 %v1087_v20  ;;  %685 = vmatpush.bf16.msrb.mxu3 %v1151_v22  ;;  %v1332_v22 = vld [vmem:[%s1600_s5 + $0x40] sm:$0xff] }
  0x57   :  { %673 = vmatpush.bf16.msrb.mxu2 %v1079_v28  ;;  %686 = vmatpush.bf16.msrb.mxu3 %v1143_v29 }
  0x5b   :  { %674 = vmatpush.bf16.msrb.mxu2 %v1071_v36  ;;  %687 = vmatpush.bf16.msrb.mxu3 %v1135_v37 }
  0x5f   :  { %675 = vmatpush.bf16.msrb.mxu2 %v1063_v48  ;;  %688 = vmatpush.bf16.msrb.mxu3 %v1127_v50 }
  0x99   :  { %v149_v38 = vpop.f32.mrf.mxu2  ;;  %v162_v43 = vpop.f32.mrf.mxu3 }
  0x9a   :  { %v150_v42 = vadd.f32 %v149_v38, %v59_v34  ;;  %v163_v46 = vadd.f32 %v162_v43, %v60_v35  ;;  %v267_v35 = vperm.slane %v264_v21, 1 }
  0x9c   :  { %v192_v47 = vmax.f32 %v150_v42, 0.0  ;;  %v193_v49 = vmax.f32 %v163_v46, 0.0 }
  0x9e   :  { %v196_v51 = vpack.c.bf16 %v192_v47, %v192_v47  ;;  %v197_v40 = vpack.c.bf16 %v193_v49, %v193_v49 }
  0xa0   :  { %598 = vmatmul.bf16.vlgmr.msra.gmra.mxu0 %v196_v51  ;;  %611 = vmatmul.bf16.vlgmr.msra.gmra.mxu1 %v197_v40 }
  0xa1   :  { %v151_v52 = vpop.f32.mrf.mxu2  ;;  %v164_v53 = vpop.f32.mrf.mxu3  ;;  %830 = vmatpush.bf16.msra.mxu0 %v1331_v2  ;;  %843 = vmatpush.bf16.msra.mxu1 %v1339_v7 }
  0xa5   :  { %831 = vmatpush.bf16.msra.mxu0 %v1330_v3  ;;  %844 = vmatpush.bf16.msra.mxu1 %v1338_v9 }
  0xa9   :  { %v175_v56 = vpop.f32.mrf.mxu2  ;;  %v188_v58 = vpop.f32.mrf.mxu3  ;;  %832 = vmatpush.bf16.msra.mxu0 %v1329_v4  ;;  %845 = vmatpush.bf16.msra.mxu1 %v1337_v11 }
  0xaa   :  { %v176_v57 = vadd.f32 %v175_v56, %v61_v54  ;;  %v189_v59 = vadd.f32 %v188_v58, %v62_v55 }
  0xac   :  { %v194_v60 = vmax.f32 %v176_v57, 0.0  ;;  %v195_v61 = vmax.f32 %v189_v59, 0.0 }
  0xad   :  { %833 = vmatpush.bf16.msra.mxu0 %v1328_v5  ;;  %846 = vmatpush.bf16.msra.mxu1 %v1336_v13 }
  0xae   :  { %v198_v62 = vpack.c.bf16 %v194_v60, %v194_v60  ;;  %v199_v63 = vpack.c.bf16 %v195_v61, %v195_v61 }
  0xb0   :  { %624 = vmatmul.bf16.vlgmr.msra.gmra.mxu2 %v198_v62  ;;  %650 = vmatmul.bf16.vlgmr.msrb.gmra.mxu0 %v196_v51 }
  0xb1   :  { %637 = vmatmul.bf16.vlgmr.msra.gmra.mxu3 %v199_v63  ;;  %663 = vmatmul.bf16.vlgmr.msrb.gmra.mxu1 %v197_v40  ;;  %v177_v0 = vpop.f32.mrf.mxu2  ;;  %v190_v1 = vpop.f32.mrf.mxu3  ;;  %v1344_v40 = vld [vmem:[%s1601_s6] ss:$0 sm:$0xff] }
  0xb2   :  { %834 = vmatpush.bf16.msra.mxu0 %v1327_v6  ;;  %847 = vmatpush.bf16.msra.mxu1 %v1335_v14 }
  0xb6   :  { %835 = vmatpush.bf16.msra.mxu0 %v1326_v8  ;;  %848 = vmatpush.bf16.msra.mxu1 %v1334_v17 }
  0xba   :  { %836 = vmatpush.bf16.msra.mxu0 %v1325_v10  ;;  %849 = vmatpush.bf16.msra.mxu1 %v1333_v18 }
  0xbe   :  { %837 = vmatpush.bf16.msra.mxu0 %v1324_v12  ;;  %850 = vmatpush.bf16.msra.mxu1 %v1332_v22 }
  0xc0   :  { %676 = vmatmul.bf16.vlgmr.msrb.gmra.mxu2 %v198_v62 }
  0xc1   :  { %689 = vmatmul.bf16.vlgmr.msrb.gmra.mxu3 %v199_v63 }
 0x11d   :  { %v599_v15 = vpop.f32.mrf.mxu0  ;;  %v612_v16 = vpop.f32.mrf.mxu1 }
 0x11e   :  { %v600_v25 = vadd.f32 %v599_v15, %v266_v23 }
 0x120   :  { %v613_v27 = vadd.f32 %v612_v16, %v600_v25 }
 0x125   :  { %v601_v19 = vpop.f32.mrf.mxu0  ;;  %v614_v20 = vpop.f32.mrf.mxu1 }
 0x12d   :  { %v651_v24 = vpop.f32.mrf.mxu0 }
 0x12e   :  { %v664_v26 = vpop.f32.mrf.mxu1  ;;  %v652_v39 = vadd.f32 %v651_v24, %v267_v35 }
 0x130   :  { %v665_v41 = vadd.f32 %v664_v26, %v652_v39 }
 0x133   :  { %v625_v28 = vpop.f32.mrf.mxu2 }
 0x134   :  { %v626_v29 = vadd.f32 %v625_v28, %v613_v27  ;;  %v638_v30 = vpop.f32.mrf.mxu3 }
 0x135   :  { %v653_v31 = vpop.f32.mrf.mxu0 }
 0x136   :  { %v639_v32 = vadd.f32 %v638_v30, %v626_v29  ;;  %v666_v33 = vpop.f32.mrf.mxu1 }
 0x138   :  { %v694_v34 = vmax.f32 %v639_v32, 0.0 }
 0x13a   :  { %v696_v36 = vpack.c.bf16 %v694_v34, %v694_v34 }
 0x13b   :  { %v627_v37 = vpop.f32.mrf.mxu2 }
 0x13c   :  { %v640_v38 = vpop.f32.mrf.mxu3  ;;  %838 = vmatmul.bf16.vlgmr.msra.gmra.mxu0 %v696_v36 }
 0x143   :  { %v677_v42 = vpop.f32.mrf.mxu2 }
 0x144   :  { %v678_v43 = vadd.f32 %v677_v42, %v665_v41  ;;  %v690_v44 = vpop.f32.mrf.mxu3 }
 0x146   :  { %v691_v45 = vadd.f32 %v690_v44, %v678_v43 }
 0x148   :  { %v695_v46 = vmax.f32 %v691_v45, 0.0 }
 0x14a   :  { %v697_v47 = vpack.c.bf16 %v695_v46, %v695_v46 }
 0x14b   :  { %v679_v48 = vpop.f32.mrf.mxu2 }
 0x14c   :  { %v692_v49 = vpop.f32.mrf.mxu3  ;;  %851 = vmatmul.bf16.vlgmr.msra.gmra.mxu1 %v697_v47 }
 0x1b9   :  { %v839_v50 = vpop.f32.mrf.mxu0 }
 0x1ba   :  { %v840_v52 = vadd.f32 %v1344_v40, %v839_v50 }
 0x1c1   :  { %v841_v51 = vpop.f32.mrf.mxu0 }
 0x1c9   :  { %v852_v53 = vpop.f32.mrf.mxu1 }
 0x1ca   :  { %v853_v54 = vadd.f32 %v852_v53, %v840_v52 }
 0x1cc   :  { %1345 = vtanh.f32 %v853_v54 }
 0x1d1   :  { %v854_v55 = vpop.f32.mrf.mxu1 }
 0x1d2   :  { %v1346_v56 = vpop.eup %1345 }
 0x1d3   :  { %858 = vst.msk [vmem:[#allocation5] sm:$0xff] %vm857_vm2, %v1346_v56 }
 0x1d4   :  { %869 = dma.vmem_to_hbm [thread:$0]  %s865_s16, 128, %s867_s19, [#allocation4]  }
 0x1d5   :  { %1397 = dma.done.wait [#allocation4], 128  }
 0x1d6   :  { %1398 = vsyncadd [#allocation4], 4294967168 }
 0x1d7   :  { %874 = vsyncpa [#allocation3], 1 }
 0x1d8   :  { %875 = vsyncpa [#allocation4], 1 }

</bundles_post_ra>
